<compile_context>
chip_gen: v7x
topology: tpu7x:2x2x1
jax: 0.10.0
libtpu: 0.0.40
codegen_flags: <defaults>
</compile_context>

<pallas_src>
import functools

import jax
import jax.numpy as jnp
from jax.experimental import pallas as pl
from jax.experimental.pallas import tpu as pltpu


C_PAD = 128   # pad the tiny class dim to a full 128-lane width (lane-dense stores)
TILE = 256    # row/col tile for the large-N path (multiple of 16 and of 128)


def _vmem_capacity_bytes():
    """Physical per-core VMEM; conservative fallback if the query is unavailable."""
    try:
        return pltpu.get_tpu_info().vmem_capacity_bytes
    except Exception:
        return 64 << 20  # v7x per-TensorCore size (most restrictive generation)


def _masked_log_softmax(z, n_classes):
    """log_softmax over the first n_classes lanes of a (rows, C_PAD) f32 block."""
    col = jax.lax.broadcasted_iota(jnp.int32, z.shape, dimension=1)
    valid = col < n_classes
    z_valid = jnp.where(valid, z, jnp.float32(-1e30))
    m = jnp.max(z_valid, axis=1, keepdims=True)
    s = z - m
    e = jnp.where(valid, jnp.exp(s), 0.0)
    lse = jnp.log(jnp.sum(e, axis=1, keepdims=True))
    return s - lse  # padded lanes hold finite garbage; sliced off in the wrapper


# --------------------------------------------------------------------------------------
# Fused path (A_hat fits VMEM): one kernel, A read from HBM exactly once, no Q round trip.
# --------------------------------------------------------------------------------------
def _fused_kernel(a_ref, w1_ref, b1_ref, w2_ref, b2_ref, o_ref, *, n_classes):
    """out = log_softmax(A @ (relu(A @ W1eff + b1) @ W2_pad) + b2), all in VMEM."""
    a = a_ref[...]  # load once, reused by both aggregations
    h = jnp.dot(a, w1_ref[...], preferred_element_type=jnp.float32)
    h = jnp.maximum(h + b1_ref[...], 0.0)
    # TODO(synk): F.dropout is active only in training mode; inference path == identity.
    q = jnp.dot(h.astype(jnp.bfloat16), w2_ref[...], preferred_element_type=jnp.float32)
    z = jnp.dot(a, q.astype(jnp.bfloat16), preferred_element_type=jnp.float32)
    z = z + b2_ref[...]
    o_ref[...] = _masked_log_softmax(z, n_classes)


# --------------------------------------------------------------------------------------
# Tiled path (large N): K-tiled layer 1 and layer 2, f32 accumulators, padded N.
# --------------------------------------------------------------------------------------
def _layer1_tiled_kernel(a_ref, w1_ref, b1_ref, w2_ref, q_ref, acc_ref):
    """acc += A_tile(tm,tk) @ W1eff_tile(tk,H); at last k: Q_tile = relu(acc+b1) @ W2_pad."""
    k = pl.program_id(1)

    @pl.when(k == 0)
    def _():
        acc_ref[...] = jnp.zeros_like(acc_ref)

    acc_ref[...] += jnp.dot(a_ref[...], w1_ref[...], preferred_element_type=jnp.float32)

    @pl.when(k == pl.num_programs(1) - 1)
    def _():
        h = jnp.maximum(acc_ref[...] + b1_ref[...], 0.0)
        # TODO(synk): dropout elided (inference). The layer-2 feature transform is fused
        # here so the layer-2 aggregation runs at N*N*C_PAD instead of N*N*H work.
        q = jnp.dot(h.astype(jnp.bfloat16), w2_ref[...],
                    preferred_element_type=jnp.float32)
        q_ref[...] = q.astype(jnp.bfloat16)


def _layer2_tiled_kernel(a_ref, q_ref, b2_ref, o_ref, acc_ref, *, n_classes):
    """acc += A_tile(tm,tk) @ Q_tile(tk,C_PAD); at last k: masked log_softmax + store."""
    k = pl.program_id(1)

    @pl.when(k == 0)
    def _():
        acc_ref[...] = jnp.zeros_like(acc_ref)

    acc_ref[...] += jnp.dot(a_ref[...], q_ref[...], preferred_element_type=jnp.float32)

    @pl.when(k == pl.num_programs(1) - 1)
    def _():
        z = acc_ref[...] + b2_ref[...]
        o_ref[...] = _masked_log_softmax(z, n_classes)


# --------------------------------------------------------------------------------------
# Wrapper
# --------------------------------------------------------------------------------------
def gcn_forward(adj_norm, w1, b1, w2, b2, x=None, *, fuse_vmem_bytes=None, tile=TILE):
    """log_softmax(A_hat @ relu(A_hat @ (X @ W1) + b1) @ W2 + b2, axis=1).

    x=None means X == eye(N) (the spec's setting): X @ W1 == W1 and that matmul is
    elided. adj_norm may be pre-cast to bf16 by the caller (recommended for repeated
    inference); it is not re-cast in that case.
    """
    n = adj_norm.shape[0]
    hdim = w1.shape[1]
    c = w2.shape[1]
    assert c <= C_PAD

    # Fold the feature matmul outside the kernels (no-op for identity features).
    w1_eff = w1 if x is None else jnp.dot(x, w1)

    # bf16 MXU operands; biases stay f32 (added to the f32 accumulators).
    a_bf16 = adj_norm if adj_norm.dtype == jnp.bfloat16 else adj_norm.astype(jnp.bfloat16)
    w1_bf16 = w1_eff.astype(jnp.bfloat16)
    b1_f32 = jnp.reshape(b1, (1, hdim)).astype(jnp.float32)

    # Pad the class dim to 128 lanes: free on the MXU, makes every store lane-dense.
    w2_pad = jnp.zeros((hdim, C_PAD), jnp.bfloat16).at[:, :c].set(w2.astype(jnp.bfloat16))
    b2_pad = jnp.zeros((1, C_PAD), jnp.float32).at[:, :c].set(
        jnp.reshape(b2, (1, c)).astype(jnp.float32))

    vmem_cap = _vmem_capacity_bytes()
    if fuse_vmem_bytes is None:
        # Fuse when the bf16 A_hat fits comfortably (<= ~1/3 of physical VMEM).
        fuse_vmem_bytes = vmem_cap // 3
    a_bytes = 2 * n * n  # bf16

    if a_bytes <= fuse_vmem_bytes:
        # ---- Fused single-call path: everything VMEM-resident, A read once. ----
        vmem_limit = max(16 << 20, min(2 * a_bytes + (8 << 20), (vmem_cap * 3) // 4))
        out_pad = pl.pallas_call(
            functools.partial(_fused_kernel, n_classes=c),
            out_shape=jax.ShapeDtypeStruct((n, C_PAD), jnp.float32),
            compiler_params=pltpu.CompilerParams(vmem_limit_bytes=int(vmem_limit)),
        )(a_bf16, w1_bf16, b1_f32, w2_pad, b2_pad)
        return out_pad[:, :c]

    # ---- Tiled path: pad N up to a multiple of the tile (zero rows/cols). ----
    t = tile
    n_pad = ((n + t - 1) // t) * t
    a_pad = jnp.zeros((n_pad, n_pad), jnp.bfloat16).at[:n, :n].set(a_bf16)
    w1_pad = jnp.zeros((n_pad, hdim), jnp.bfloat16).at[:n, :].set(w1_bf16)

    grid = (n_pad // t, n_pad // t)  # (row tiles "parallel", K tiles "arbitrary")
    params = pltpu.CompilerParams(
        dimension_semantics=("parallel", "arbitrary"),
        vmem_limit_bytes=32 << 20,  # tiles are < 1 MiB; explicit for v7x headroom
    )

    # Layer 1 (+ fused layer-2 feature transform): Q = relu(A W1eff + b1) W2_pad.
    q = pl.pallas_call(
        _layer1_tiled_kernel,
        out_shape=jax.ShapeDtypeStruct((n_pad, C_PAD), jnp.bfloat16),
        grid=grid,
        in_specs=[
            pl.BlockSpec((t, t), lambda i, k: (i, k)),        # A_hat tile
            pl.BlockSpec((t, hdim), lambda i, k: (k, 0)),     # W1eff K-slab
            pl.BlockSpec((1, hdim), lambda i, k: (0, 0)),     # b1
            pl.BlockSpec((hdim, C_PAD), lambda i, k: (0, 0)),  # W2 (lane-padded)
        ],
        out_specs=pl.BlockSpec((t, C_PAD), lambda i, k: (i, 0)),
        scratch_shapes=[pltpu.VMEM((t, hdim), jnp.float32)],
        compiler_params=params,
    )(a_pad, w1_pad, b1_f32, w2_pad)

    # Layer 2 aggregation + log_softmax: out = logsoftmax(A Q + b2).
    out_pad = pl.pallas_call(
        functools.partial(_layer2_tiled_kernel, n_classes=c),
        out_shape=jax.ShapeDtypeStruct((n_pad, C_PAD), jnp.float32),
        grid=grid,
        in_specs=[
            pl.BlockSpec((t, t), lambda i, k: (i, k)),        # A_hat tile
            pl.BlockSpec((t, C_PAD), lambda i, k: (k, 0)),    # Q K-slab
            pl.BlockSpec((1, C_PAD), lambda i, k: (0, 0)),    # b2 (lane-padded)
        ],
        out_specs=pl.BlockSpec((t, C_PAD), lambda i, k: (i, 0)),
        scratch_shapes=[pltpu.VMEM((t, C_PAD), jnp.float32)],
        compiler_params=params,
    )(a_pad, q, b2_pad)

    return out_pad[:n, :c]


# --------------------------------------------------------------------------------------
# Plain-JAX glue + demo
# --------------------------------------------------------------------------------------
def build_normalized_adjacency(n_nodes, edges):
    """Dense A_hat = D^{-1/2} (A + I) D^{-1/2} (plain-JAX glue; f32)."""
    a = jnp.zeros((n_nodes, n_nodes), dtype=jnp.float32)
    rows = jnp.array([e[0] for e in edges] + [e[1] for e in edges], dtype=jnp.int32)
    cols = jnp.array([e[1] for e in edges] + [e[0] for e in edges], dtype=jnp.int32)
    a = a.at[rows, cols].set(1.0)
    a = a + jnp.eye(n_nodes, dtype=jnp.float32)  # self loops
    deg = jnp.sum(a, axis=1)
    d_inv_sqrt = 1.0 / jnp.sqrt(deg)
    return a * d_inv_sqrt[:, None] * d_inv_sqrt[None, :]


def _reference(adj, w1, b1, w2, b2):
    """Pure f32 JAX reference: log_softmax(A relu(A W1 + b1) W2 + b2) (X == I)."""
    h = jnp.maximum(adj @ w1 + b1[None, :], 0.0)
    z = adj @ (h @ w2) + b2[None, :]
    return jax.nn.log_softmax(z, axis=1)


if __name__ == "__main__":
    HIDDEN = 16
    CLASSES = 2
    key = jax.random.PRNGKey(0)
    k1, k2, k3, k4 = jax.random.split(key, 4)
    b1 = jnp.zeros((HIDDEN,), jnp.float32)
    b2 = jnp.zeros((CLASSES,), jnp.float32)
    lim2 = (6.0 / (HIDDEN + CLASSES)) ** 0.5

    # --- Case 1: the spec's tiny graph (identity features) -> fused single-call path.
    N = 16
    ring = [(i, (i + 1) % N) for i in range(N)]
    chords = [(0, 8), (2, 10), (4, 12), (6, 14), (1, 9)]
    adj = build_normalized_adjacency(N, ring + chords)       # f32, for the reference
    adj_bf16 = adj.astype(jnp.bfloat16)                      # cast once, reuse per forward

    lim1 = (6.0 / (N + HIDDEN)) ** 0.5
    w1 = jax.random.uniform(k1, (N, HIDDEN), jnp.float32, -lim1, lim1)
    w2 = jax.random.uniform(k2, (HIDDEN, CLASSES), jnp.float32, -lim2, lim2)

    out = jax.block_until_ready(gcn_forward(adj_bf16, w1, b1, w2, b2, x=None))
    ref = _reference(adj, w1, b1, w2, b2)
    assert out.shape == (N, CLASSES)
    assert bool(jnp.all(jnp.abs(jnp.sum(jnp.exp(out), axis=1) - 1.0) < 1e-5))
    assert bool(jnp.max(jnp.abs(out - ref)) < 5e-2)

    # --- Case 2: larger graph with N not a tile multiple -> tiled path (forced) + padding.
    N2 = 500
    ring2 = [(i, (i + 1) % N2) for i in range(N2)]
    chords2 = [(i, (i + 37) % N2) for i in range(0, N2, 5)]
    adj2 = build_normalized_adjacency(N2, ring2 + chords2)
    adj2_bf16 = adj2.astype(jnp.bfloat16)

    lim1b = (6.0 / (N2 + HIDDEN)) ** 0.5
    w1b = jax.random.uniform(k3, (N2, HIDDEN), jnp.float32, -lim1b, lim1b)
    w2b = jax.random.uniform(k4, (HIDDEN, CLASSES), jnp.float32, -lim2, lim2)

    out2 = jax.block_until_ready(
        gcn_forward(adj2_bf16, w1b, b1, w2b, b2, x=None, fuse_vmem_bytes=0, tile=TILE))
    ref2 = _reference(adj2_bf16.astype(jnp.float32), w1b, b1, w2b, b2)
    assert out2.shape == (N2, CLASSES)
    assert bool(jnp.all(jnp.abs(jnp.sum(jnp.exp(out2), axis=1) - 1.0) < 1e-5))
    assert bool(jnp.max(jnp.abs(out2 - ref2)) < 5e-2)

    print("KERNEL_OK")
</pallas_src>

<mosaic_0001>
module attributes {stable_mosaic.version = 11 : i64} {
  func.func @_fused_kernel(%arg0: memref<16x16xbf16, #tpu.memory_space<vmem>>, %arg1: memref<16x16xbf16, #tpu.memory_space<vmem>>, %arg2: memref<1x16xf32, #tpu.memory_space<vmem>>, %arg3: memref<16x128xbf16, #tpu.memory_space<vmem>>, %arg4: memref<1x128xf32, #tpu.memory_space<vmem>>, %arg5: memref<16x128xf32, #tpu.memory_space<vmem>>) attributes {dimension_semantics = [], scalar_prefetch = 0 : i64, scratch_operands = 0 : i64, tpu.core_type = #tpu.core_type<tc>} {
    %c0 = arith.constant 0 : index
    %c0_0 = arith.constant 0 : index
    %0 = vector.load %arg0[%c0, %c0_0] : memref<16x16xbf16, #tpu.memory_space<vmem>>, vector<16x16xbf16>
    %c0_1 = arith.constant 0 : index
    %c0_2 = arith.constant 0 : index
    %1 = vector.load %arg1[%c0_1, %c0_2] : memref<16x16xbf16, #tpu.memory_space<vmem>>, vector<16x16xbf16>
    %cst = arith.constant dense<0.000000e+00> : vector<16x16xf32>
    %2 = tpu.matmul %0, %1, %cst {dimension_numbers = #tpu.dot_dimension_numbers<[1], [0], [0], [1], [0, 0, 1, 1], [], []>} : vector<16x16xbf16>, vector<16x16xbf16>, vector<16x16xf32> -> vector<16x16xf32>
    %c0_3 = arith.constant 0 : index
    %c0_4 = arith.constant 0 : index
    %3 = vector.load %arg2[%c0_3, %c0_4] : memref<1x16xf32, #tpu.memory_space<vmem>>, vector<1x16xf32>
    %4 = vector.broadcast %3 : vector<1x16xf32> to vector<16x16xf32>
    %5 = arith.addf %2, %4 : vector<16x16xf32>
    %cst_5 = arith.constant 0.000000e+00 : f32
    %6 = vector.broadcast %cst_5 : f32 to vector<16x16xf32>
    %7 = arith.maximumf %5, %6 : vector<16x16xf32>
    %8 = arith.truncf %7 : vector<16x16xf32> to vector<16x16xbf16>
    %c0_6 = arith.constant 0 : index
    %c0_7 = arith.constant 0 : index
    %9 = vector.load %arg3[%c0_6, %c0_7] : memref<16x128xbf16, #tpu.memory_space<vmem>>, vector<16x128xbf16>
    %cst_8 = arith.constant dense<0.000000e+00> : vector<16x128xf32>
    %10 = tpu.matmul %8, %9, %cst_8 {dimension_numbers = #tpu.dot_dimension_numbers<[1], [0], [0], [1], [0, 0, 1, 1], [], []>} : vector<16x16xbf16>, vector<16x128xbf16>, vector<16x128xf32> -> vector<16x128xf32>
    %11 = arith.truncf %10 : vector<16x128xf32> to vector<16x128xbf16>
    %cst_9 = arith.constant dense<0.000000e+00> : vector<16x128xf32>
    %12 = tpu.matmul %0, %11, %cst_9 {dimension_numbers = #tpu.dot_dimension_numbers<[1], [0], [0], [1], [0, 0, 1, 1], [], []>} : vector<16x16xbf16>, vector<16x128xbf16>, vector<16x128xf32> -> vector<16x128xf32>
    %c0_10 = arith.constant 0 : index
    %c0_11 = arith.constant 0 : index
    %13 = vector.load %arg4[%c0_10, %c0_11] : memref<1x128xf32, #tpu.memory_space<vmem>>, vector<1x128xf32>
    %14 = vector.broadcast %13 : vector<1x128xf32> to vector<16x128xf32>
    %15 = arith.addf %12, %14 : vector<16x128xf32>
    %16 = tpu.iota {dimensions = array<i32: 1>} : vector<16x128xi32>
    %c2_i32 = arith.constant 2 : i32
    %17 = vector.broadcast %c2_i32 : i32 to vector<16x128xi32>
    %18 = arith.cmpi slt, %16, %17 : vector<16x128xi32>
    %cst_12 = arith.constant -1.000000e+30 : f32
    %19 = vector.broadcast %cst_12 : f32 to vector<16x128xf32>
    %20 = arith.select %18, %15, %19 : vector<16x128xi1>, vector<16x128xf32>
    %cst_13 = arith.constant dense<0xFF800000> : vector<16xf32>
    %21 = vector.multi_reduction <maximumf>, %20, %cst_13 [1] : vector<16x128xf32> to vector<16xf32>
    %22 = vector.shape_cast %21 : vector<16xf32> to vector<16x1xf32>
    %23 = vector.broadcast %22 : vector<16x1xf32> to vector<16x128xf32>
    %24 = arith.subf %15, %23 : vector<16x128xf32>
    %25 = math.exp %24 : vector<16x128xf32>
    %cst_14 = arith.constant 0.000000e+00 : f32
    %26 = vector.broadcast %cst_14 : f32 to vector<16x128xf32>
    %27 = arith.select %18, %25, %26 : vector<16x128xi1>, vector<16x128xf32>
    %cst_15 = arith.constant dense<0.000000e+00> : vector<16xf32>
    %28 = vector.multi_reduction <add>, %27, %cst_15 [1] : vector<16x128xf32> to vector<16xf32>
    %29 = vector.shape_cast %28 : vector<16xf32> to vector<16x1xf32>
    %30 = math.log %29 : vector<16x1xf32>
    %31 = vector.broadcast %30 : vector<16x1xf32> to vector<16x128xf32>
    %32 = arith.subf %24, %31 : vector<16x128xf32>
    %c0_16 = arith.constant 0 : index
    %c0_17 = arith.constant 0 : index
    %33 = vector.load %arg5[%c0_16, %c0_17] : memref<16x128xf32, #tpu.memory_space<vmem>>, vector<16x128xf32>
    tpu.vector_store %arg5[%c0_16, %c0_17], %32 {strides = array<i32>} : memref<16x128xf32, #tpu.memory_space<vmem>>, vector<16x128xf32>,
    return
  }
}

</mosaic_0001>

<bundles_post_ra>
// kernel: tpu_custom_call.1
= control target key start
LH: loop header
LB: loop body
LE: loop exit
PB: predicated region body
PF: predicated region fallthrough
CT: control target
= control target key end

     0   :  { %10 = vsyncpa [#allocation3], 0  ;;  %s483_s0 = inlined_call_operand.hbm [shape: bf16[16,16], index: 0, kind: input, shape index: {}]   ;;  %s484_s1 = inlined_call_operand.hbm [shape: bf16[16,16], index: 1, kind: input, shape index: {}]   ;;  %s485_s2 = inlined_call_operand.vmem [shape: f32[1,16], index: 2, kind: input, shape index: {}]   ;;  %s486_s3 = inlined_call_operand.vmem [shape: bf16[16,128], index: 3, kind: input, shape index: {}]   ;;  %s487_s4 = inlined_call_operand.vmem [shape: f32[1,128], index: 4, kind: input, shape index: {}]   ;;  %s488_s5 = inlined_call_operand.hbm [shape: f32[16,128], index: 5, kind: output, shape index: {}]  }
   0x1   :  { %11 = vsyncpa [#allocation6], 0 }
   0x2   :  { %12 = vsyncpa [#allocation4], 0  ;;  %s392_s18 = smov [#allocation2]   ;;  %s320_s22 = scalar_lea.hbm %s483_s0, 128 }
   0x3   :  { %s18_s19 = sshll.u32 %s392_s18, 4  ;;  %p321_p0 = scmp.ne.s32.totalorder %s483_s0, %s320_s22  ;;  %s19_s19 = int_to_ptr.vmem [resolvable:$true] %s18_s19 }
   0x4   :  { %p324_p1 = scmp.lt.u32.totalorder %s320_s22, %s483_s0 }
   0x6   :  { %p326_p2 = pnand %p324_p1, %p321_p0 }
   0x8   :  { %329 = shalt.err (!%p326_p2)
}
   0x9   :  { %s330_s27 = scalar_lea.vmem %s19_s19, 128  ;;  %p335_p4 = scmp.lt.s32.totalorder %s19_s19, %s19_s19 }
   0xa   :  { %p331_p3 = scmp.ne.s32.totalorder %s19_s19, %s330_s27  ;;  %p336_p5 = scmp.lt.s32.totalorder %s330_s27, %s330_s27 }
   0xc   :  { %p337_p6 = por %p336_p5, %p335_p4 }
   0xe   :  { %p338_p7 = pnand %p337_p6, %p331_p3 }
  0x10   :  { %341 = shalt.err (!%p338_p7)
}
  0x11   :  { %s393_s28 = smov 64   ;;  %s394_s29 = smov 4  }
  0x12   :  { %24 = dma.hbm_to_vmem [thread:$0]  %s483_s0, 128, %s19_s19, [#allocation3], %s393_s28, %s393_s28, %s394_s29  }
  0x13   :  { %s395_s7 = smov [#allocation5]   ;;  %s342_s11 = scalar_lea.hbm %s484_s1, 128 }
  0x14   :  { %s30_s8 = sshll.u32 %s395_s7, 4  ;;  %p343_p8 = scmp.ne.s32.totalorder %s484_s1, %s342_s11  ;;  %s31_s8 = int_to_ptr.vmem [resolvable:$true] %s30_s8 }
  0x15   :  { %p346_p9 = scmp.lt.u32.totalorder %s342_s11, %s484_s1 }
  0x17   :  { %p348_p10 = pnand %p346_p9, %p343_p8 }
  0x19   :  { %351 = shalt.err (!%p348_p10)
}
  0x1a   :  { %s352_s16 = scalar_lea.vmem %s31_s8, 128  ;;  %p357_p12 = scmp.lt.s32.totalorder %s31_s8, %s31_s8 }
  0x1b   :  { %p353_p11 = scmp.ne.s32.totalorder %s31_s8, %s352_s16  ;;  %p358_p13 = scmp.lt.s32.totalorder %s352_s16, %s352_s16 }
  0x1d   :  { %p359_p0 = por %p358_p13, %p357_p12 }
  0x1f   :  { %p360_p1 = pnand %p359_p0, %p353_p11 }
  0x21   :  { %363 = shalt.err (!%p360_p1)
}
  0x22   :  { %36 = dma.hbm_to_vmem [thread:$0]  %s484_s1, 128, %s31_s8, [#allocation6], %s393_s28, %s393_s28, %s394_s29  }
  0x23   :  { %386 = dma.done.wait [#allocation3], 128  }
  0x24   :  { %387 = vsyncadd [#allocation3], 4294967168 }
  0x25   :  { %388 = dma.done.wait [#allocation6], 128  }
  0x26   :  { %389 = vsyncadd [#allocation6], 4294967168  ;;  %v396_v0 = vmov 0.0   ;;  %vm397_vm0 = vmmov 0   ;;  %v309_v1 = vld [vmem:[#allocation5] sm:$0xff]   ;;  %v310_v2 = vld [vmem:[#allocation2] sm:$0xff]   ;;  %v221_v19 = vlaneseq }
  0x27   :  { %282 = vmatprep.subr.bf16.mxu0 %v396_v0  ;;  %284 = vmatprep.mubr.msk.bf16.mxu0 %vm397_vm0, %v396_v0  ;;  %vm72_vm1 = vcmask 130048   ;;  %v311_v3 = vld [vmem:[%s486_s3] sm:$0xff]  }
  0x28   :  { %288 = vmatprep.subr.bf16.mxu1 %v396_v0  ;;  %290 = vmatprep.mubr.msk.bf16.mxu1 %vm397_vm0, %v396_v0  ;;  %v268_v4 = vld [vmem:[%s485_s2] ss:$0 sm:$0xff]  ;;  %v222_v20 = vand.u32 127, %v221_v19 }
  0x29   :  { %283 = vmatpush3.bf16.msra.mxu0 %v309_v1  ;;  %289 = vmatpush3.bf16.msra.mxu1 %v311_v3  ;;  %v274_v21 = vld [vmem:[%s487_s4] ss:$0 sm:$0xff]  ;;  %s398_s4 = smov [#allocation7]  }
  0x2a   :  { %294 = vmatprep.subr.bf16.mxu0 %v396_v0  ;;  %vm223_vm2 = vcmp.lt.s32.totalorder %v222_v20, 2  ;;  %s255_s21 = sshll.u32 %s398_s4, 4  ;;  %s256_s21 = int_to_ptr.vmem [resolvable:$true] %s255_s21 }
  0x2b   :  { %s364_s22 = scalar_lea.vmem %s256_s21, 256  ;;  %p369_p3 = scmp.lt.s32.totalorder %s256_s21, %s256_s21 }
  0x2c   :  { %285 = vmatmul.mubr.msk.bf16.vlgmr.msra.gmra.mrb[0].mxu0 %vm72_vm1, %v310_v2  ;;  %p365_p2 = scmp.ne.s32.totalorder %s256_s21, %s364_s22  ;;  %p370_p4 = scmp.lt.s32.totalorder %s364_s22, %s364_s22 }
  0x2d   :  { %296 = vmatprep.mubr.msk.bf16.mxu0 %vm397_vm0, %v396_v0 }
  0x2e   :  { %p371_p5 = por %p370_p4, %p369_p3 }
  0x30   :  { %p372_p6 = pnand %p371_p5, %p365_p2 }
  0xff   :  { %v110_v5 = vpop.f32.mrb[0].mxu0 }
 0x100   :  { %v111_v6 = vadd.f32 %v268_v4, %v110_v5  ;;  %v286_v7 = vpop.f32.mrb[1].mxu0 }
 0x101   :  { %v113_v8 = vpop.f32.mrb[2].mxu0 }
 0x102   :  { %v114_v9 = vadd.f32 %v268_v4, %v113_v8  ;;  %v287_v10 = vpop.f32.mrb[3].mxu0  ;;  %v117_v11 = vmax.f32 %v111_v6, 0.0 }
 0x104   :  { %v118_v12 = vmax.f32 %v114_v9, 0.0 }
 0x106   :  { %v119_v13 = vpack.c.bf16 %v118_v12, %v117_v11 }
 0x108   :  { %291 = vmatmul.mubr.msk.bf16.vlgmr.msra.gmra.mrb[0].mxu1 %vm72_vm1, %v119_v13 }
 0x1db   :  { %v165_v14 = vpop.f32.mrb[0].mxu1 }
 0x1dc   :  { %v292_v15 = vpop.f32.mrb[1].mxu1 }
 0x1dd   :  { %v168_v16 = vpop.f32.mrb[2].mxu1 }
 0x1de   :  { %v172_v17 = vpack.c.bf16 %v168_v16, %v165_v14  ;;  %v293_v18 = vpop.f32.mrb[3].mxu1 }
 0x1e0   :  { %295 = vmatpush3.bf16.msra.mxu0 %v172_v17 }
 0x1e3   :  { %297 = vmatmul.mubr.msk.bf16.vlgmr.msra.gmra.mrb[4].mxu0 %vm72_vm1, %v310_v2 }
 0x2b6   :  { %v214_v22 = vpop.f32.mrb[4].mxu0 }
 0x2b7   :  { %v215_v23 = vadd.f32 %v274_v21, %v214_v22  ;;  %v298_v24 = vpop.f32.mrb[5].mxu0 }
 0x2b8   :  { %v217_v25 = vpop.f32.mrb[6].mxu0 }
 0x2b9   :  { %v224_v26 = vsel %vm223_vm2, %v215_v23, -1e+30  ;;  %v218_v27 = vadd.f32 %v274_v21, %v217_v25  ;;  %v299_v28 = vpop.f32.mrb[7].mxu0 }
 0x2ba   :  { %226 = vmax.xlane.f32.xlu0 %v224_v26 }
 0x2bb   :  { %v225_v29 = vsel %vm223_vm2, %v218_v27, -1e+30 }
 0x2be   :  { %228 = vmax.xlane.f32.xlu0 %v225_v29 }
 0x347   :  { %v227_v30 = vpop.xlane.xlu0 %226 }
 0x348   :  { %v230_v31 = vsub.f32 %v215_v23, %v227_v30 }
 0x34a   :  { %v232_v32 = vmul.f32 1.442695, %v230_v31 }
 0x34b   :  { %v229_v33 = vpop.xlane.xlu0 %228 }
 0x34c   :  { %312 = vpow2.f32 %v232_v32  ;;  %v231_v34 = vsub.f32 %v218_v27, %v229_v33 }
 0x34e   :  { %v234_v35 = vmul.f32 1.442695, %v231_v34 }
 0x350   :  { %314 = vpow2.f32 %v234_v35 }
 0x356   :  { %v313_v36 = vpop.eup %312 }
 0x357   :  { %v236_v37 = vsel %vm223_vm2, %v313_v36, 0.0 }
 0x358   :  { %238 = vadd.xlane.f32.xlu1 %v236_v37 }
 0x35a   :  { %v315_v38 = vpop.eup %314 }
 0x35b   :  { %v237_v39 = vsel %vm223_vm2, %v315_v38, 0.0 }
 0x35c   :  { %240 = vadd.xlane.f32.xlu1 %v237_v39 }
 0x3e5   :  { %v239_v40 = vpop.xlane.xlu1 %238 }
 0x3e6   :  { %316 = vlog2.f32 %v239_v40 }
 0x3e9   :  { %v241_v41 = vpop.xlane.xlu1 %240 }
 0x3ea   :  { %318 = vlog2.f32 %v241_v41 }
 0x3f0   :  { %v317_v42 = vpop.eup %316 }
 0x3f1   :  { %v243_v43 = vmul.f32 0.6931472, %v317_v42 }
 0x3f3   :  { %v246_v44 = vsub.f32 %v230_v31, %v243_v43 }
 0x3f4   :  { %v319_v45 = vpop.eup %318 }
 0x3f5   :  { %248 = vst [vmem:[#allocation7] sm:$0xff] %v246_v44  ;;  %v245_v46 = vmul.f32 0.6931472, %v319_v45 }
 0x3f7   :  { %v247_v47 = vsub.f32 %v231_v34, %v245_v46 }
 0x3f9   :  { %249 = vst [vmem:[#allocation7 + $0x8] sm:$0xff] %v247_v47 }
 0x3fa   :  { %375 = shalt.err (!%p372_p6)
}
 0x3fb   :  { %s376_s25 = scalar_lea.hbm %s488_s5, 256 }
 0x3fc   :  { %p377_p7 = scmp.ne.s32.totalorder %s488_s5, %s376_s25  ;;  %p380_p8 = scmp.lt.u32.totalorder %s376_s25, %s488_s5 }
 0x3fe   :  { %p382_p9 = pnand %p380_p8, %p377_p7 }
 0x400   :  { %385 = shalt.err (!%p382_p9)
}
 0x401   :  { %s399_s30 = smov 128   ;;  %s400_s6 = smov 8  }
 0x402   :  { %261 = dma.vmem_to_hbm [thread:$0]  %s256_s21, 256, %s488_s5, [#allocation4], %s399_s30, %s399_s30, %s400_s6  }
 0x403   :  { %390 = dma.done.wait [#allocation4], 256  }
 0x404   :  { %391 = vsyncadd [#allocation4], 4294967040 }
 0x405   :  { %265 = vsyncpa [#allocation3], 1 }
 0x406   :  { %266 = vsyncpa [#allocation6], 1 }
 0x407   :  { %267 = vsyncpa [#allocation4], 1 }

</bundles_post_ra>
